<compile_context>
chip_gen: v7x
topology: tpu7x:2x2x1
jax: 0.10.0
libtpu: 0.0.40
codegen_flags: <defaults>
</compile_context>

<pallas_src>
import functools

import jax
import jax.numpy as jnp
from jax.experimental import pallas as pl
from jax.experimental.pallas import tpu as pltpu

_LANE = 128
_SUBLANE = 8

# Probed on the first pallas_call: does this jax support pl.Buffered(1) as a
# BlockSpec pipeline_mode?  None = unknown, True/False after first call.
_SINGLE_BUFFER_WEIGHTS_OK = None


def _round_up(n, m):
    return ((n + m - 1) // m) * m


def _tpu_generation():
    """Best-effort TPU generation (5 / 6 / 7) used for layout + VMEM tuning."""
    try:
        kind = jax.devices()[0].device_kind.lower()
    except Exception:
        return 6
    for g in (7, 6, 5, 4):
        if f"v{g}" in kind:
            return g
    return 6


def _pad_dim(d, gen):
    """Pad a feature dim so it is lane-dense (multiple of 128).

    On v6e/v7x (2x256^2 MXUs) an odd multiple of 128 leaves half the systolic
    array idle, so dims already above 256 are rounded up to a multiple of 256.
    Dims <= 128 stay at 128 (bumping them to 256 only adds HBM traffic; the
    MXU is underfilled either way).
    """
    p = _round_up(d, _LANE)
    if gen >= 6 and p >= 2 * _LANE and (p // _LANE) % 2 == 1:
        p = _round_up(d, 2 * _LANE)
    return p


# --------------------------------------------------------------------------
# Pallas kernel: y2 = x2 +/- MLP(x1), streamed over the batch dim.
# --------------------------------------------------------------------------
def _coupling_kernel(reverse, n_layers, act_dtype, *refs):
    """refs = (x1_ref, x2_ref, w0, b0, ..., w_{n-1}, b_{n-1}, out_ref).

    x1/x2/out blocks: (TL, half_pad).  Weights: (in_pad, out_pad) in the MXU
    compute dtype, resident in VMEM (constant index_map).  Biases: f32
    (1, out_pad).  MXU matmuls accumulate in f32; bias/ReLU/coupling add run
    on the VPU in f32 with a single downcast per hidden layer.
    """
    x1_ref, x2_ref = refs[0], refs[1]
    out_ref = refs[-1]
    wb = refs[2:-1]

    # First layer: feed x1 straight into the MXU compute dtype (no f32 trip).
    h = x1_ref[...]
    t = None
    for i in range(n_layers):
        w = wb[2 * i][...]
        b = wb[2 * i + 1][...]
        z = jnp.dot(h.astype(w.dtype), w,
                    preferred_element_type=jnp.float32) + b
        if i < n_layers - 1:
            # ReLU in f32, then one downcast to the hidden activation dtype
            # (bf16 on v6e/v7x, f32 on v5e which has no bf16 VPU).
            h = jnp.maximum(z, 0.0).astype(act_dtype)
        else:
            t = z                                    # (TL, half_pad), f32

    x2 = x2_ref[...].astype(jnp.float32)
    y2 = x2 - t if reverse else x2 + t
    out_ref[...] = y2.astype(out_ref.dtype)


@functools.lru_cache(maxsize=None)
def _build_coupling_call(l, half_pad, tl, param_shapes, param_dtypes,
                         out_dtype_name, reverse, act_dtype_name,
                         single_buffer, gen):
    """Build (and cache) the pallas_call for one coupling configuration."""
    n_layers = len(param_shapes) // 2
    act_dtype = jnp.dtype(act_dtype_name)
    out_dtype = jnp.dtype(out_dtype_name)

    grid = (pl.cdiv(l, tl),)
    act_spec = pl.BlockSpec((tl, half_pad), lambda i: (i, 0))

    wb_specs = []
    for shape in param_shapes:
        if single_buffer:
            # Constant index_map -> the block never revolves, so a single VMEM
            # buffer suffices (halves resident-weight footprint; important on
            # v7x where each of the 2 TCs holds its own copy in 64 MiB VMEM).
            spec = pl.BlockSpec(shape, lambda i: (0, 0),
                                pipeline_mode=pl.Buffered(1))
        else:
            spec = pl.BlockSpec(shape, lambda i: (0, 0))
        wb_specs.append(spec)

    # ---- VMEM budget from actual buffer sizes (generation-aware cap) ----
    param_bytes = 0
    for shape, dt in zip(param_shapes, param_dtypes):
        sz = 1
        for s in shape:
            sz *= s
        param_bytes += sz * jnp.dtype(dt).itemsize
    wb_factor = 1 if single_buffer else 2
    io_bytes = 3 * 2 * tl * half_pad * 4            # x1/x2/out, double-buffered
    max_feat = max(shape[1] for shape in param_shapes[::2])
    hidden_bytes = 4 * tl * max_feat * 4            # live f32 intermediates
    needed = wb_factor * param_bytes + io_bytes + hidden_bytes
    cap = (40 << 20) if gen >= 7 else (100 << 20)   # v7x: 64 MiB/TC physical
    vmem_limit = int(min(cap, max(needed + needed // 2, 16 << 20)))

    # ---- advisory cost estimate ----
    flops = sum(2 * l * shape[0] * shape[1] for shape in param_shapes[::2])
    bytes_accessed = 3 * l * half_pad * out_dtype.itemsize + param_bytes

    kernel = functools.partial(_coupling_kernel, reverse, n_layers, act_dtype)

    return pl.pallas_call(
        kernel,
        out_shape=jax.ShapeDtypeStruct((l, half_pad), out_dtype),
        grid_spec=pltpu.PrefetchScalarGridSpec(
            num_scalar_prefetch=0,
            grid=grid,
            in_specs=[act_spec, act_spec] + wb_specs,
            out_specs=act_spec,
        ),
        compiler_params=pltpu.CompilerParams(
            dimension_semantics=("parallel",),      # megacore: shard batch tiles
            vmem_limit_bytes=vmem_limit,
        ),
        cost_estimate=pl.CostEstimate(
            flops=int(flops), transcendentals=0,
            bytes_accessed=int(bytes_accessed)),
    )


def _run_coupling_mlp(x1, x2, params, reverse, *, block_l=None, act_dtype=None,
                      generation=None):
    """y2 = x2 +/- MLP(x1) on lane-dense, already-padded (L, half_pad) arrays."""
    global _SINGLE_BUFFER_WEIGHTS_OK

    l, half_pad = x1.shape
    assert half_pad % _LANE == 0, "inputs must be padded to a lane multiple"
    assert params[0].shape[0] == half_pad

    gen = _tpu_generation() if generation is None else generation
    if act_dtype is None:
        act_dtype = jnp.bfloat16 if gen >= 6 else jnp.float32
    if block_l is None:
        # Bigger tiles on 128-MiB-VMEM parts (v5e/v6e), moderate on v7x.
        block_l = 512 if gen >= 7 else 1024

    tl = min(block_l, _round_up(l, _SUBLANE))

    param_shapes = tuple(tuple(int(s) for s in p.shape) for p in params)
    param_dtypes = tuple(jnp.dtype(p.dtype).name for p in params)
    common = (l, half_pad, tl, param_shapes, param_dtypes,
              jnp.dtype(x2.dtype).name, bool(reverse),
              jnp.dtype(act_dtype).name)

    if _SINGLE_BUFFER_WEIGHTS_OK is not False:
        try:
            fn = _build_coupling_call(*common, True, gen)
            out = fn(x1, x2, *params)
            _SINGLE_BUFFER_WEIGHTS_OK = True
            return out
        except Exception:
            # pipeline_mode=pl.Buffered(1) not supported by this jax version;
            # fall back to default double-buffered resident weights.
            _SINGLE_BUFFER_WEIGHTS_OK = False
    fn = _build_coupling_call(*common, False, gen)
    return fn(x1, x2, *params)


# --------------------------------------------------------------------------
# Parameter helpers.
# --------------------------------------------------------------------------
def init_coupling_params(key, in_out_dim, mid_dim, hidden, dtype=jnp.float32):
    """Deterministic init matching the PyTorch layer shapes (unpadded, f32).

    Layers: Linear(half, mid), [Linear(mid, mid)] * (hidden-1), Linear(mid, half).
    Weights stored as (in, out); biases as (1, out).
    """
    half = in_out_dim // 2
    dims = [half] + [mid_dim] * hidden + [half]
    params = []
    for i in range(len(dims) - 1):
        d_in, d_out = dims[i], dims[i + 1]
        key, kw, kb = jax.random.split(key, 3)
        bound = float(d_in) ** -0.5
        params.append(jax.random.uniform(kw, (d_in, d_out), dtype, -bound, bound))
        params.append(jax.random.uniform(kb, (1, d_out), dtype, -bound, bound))
    return params


def prepare_coupling_params(params, compute_dtype=jnp.bfloat16, generation=None):
    """One-time param prep (outside the kernel / grid loop).

    Zero-pads EVERY feature dim — including the external `half` in/out dims —
    to a lane-dense size (see `_pad_dim`) so all matmuls and the output store
    are unmasked, and casts weights to the MXU compute dtype (pass
    compute_dtype=jnp.float32 for an exact-matmul fallback).  Biases stay f32.
    Padded rows/cols/bias entries are zero, so they never leak into real lanes.
    """
    gen = _tpu_generation() if generation is None else generation
    n_layers = len(params) // 2
    prepped = []
    for i in range(n_layers):
        w = jnp.asarray(params[2 * i], jnp.float32)
        b = jnp.asarray(params[2 * i + 1], jnp.float32).reshape(1, -1)
        d_in, d_out = w.shape
        in_pad = _pad_dim(d_in, gen)
        out_pad = _pad_dim(d_out, gen)
        w = jnp.pad(w, ((0, in_pad - d_in), (0, out_pad - d_out)))
        b = jnp.pad(b, ((0, 0), (0, out_pad - d_out)))
        prepped.append(w.astype(compute_dtype))
        prepped.append(b.astype(jnp.float32))
    return prepped


# --------------------------------------------------------------------------
# NICE model forward (semantics-exact port of the PyTorch module).
# --------------------------------------------------------------------------
def additive_coupling_forward(x, log_det_J, params, mask_config, reverse=False):
    """Single AdditiveCoupling.forward (kept for per-layer API parity).

    For a full flow prefer `nice_f`/`nice_forward`, which keep the model in
    split even/odd layout and (de)interleave only once at the boundaries.
    """
    L, W = x.shape
    half = W // 2
    x3 = x.reshape(L, half, 2)
    if mask_config:
        x1, x2 = x3[:, :, 1], x3[:, :, 0]
    else:
        x1, x2 = x3[:, :, 0], x3[:, :, 1]

    half_pad = params[0].shape[0]
    pad = half_pad - half
    x1p = jnp.pad(x1, ((0, 0), (0, pad)))
    x2p = jnp.pad(x2, ((0, 0), (0, pad)))
    y2 = _run_coupling_mlp(x1p, x2p, params, reverse)[:, :half]
    y1 = x1
    if mask_config:
        out = jnp.stack((y2, y1), axis=2)
    else:
        out = jnp.stack((y1, y2), axis=2)
    return out.reshape(L, W), log_det_J


def scaling_forward(x, scale_param, reverse=False, eps=1e-5):
    """Port of Scaling.forward (exactly as written in the reference module)."""
    scale = jnp.exp(scale_param) + eps
    log_det_J = jnp.sum(scale)
    x = x * jnp.exp(-scale) if reverse else x * jnp.exp(scale)
    return x, log_det_J


def _normal_log_prob(z, mu, sig):
    return (-0.5 * ((z - mu) / sig) ** 2 - jnp.log(sig)
            - 0.5 * jnp.log(2.0 * jnp.pi))


def nice_f(x, coupling_params, scale_param, generation=None):
    """NICE.f : X -> Z.  Couplings run in split even/odd layout (padded once)."""
    L, W = x.shape
    half = W // 2
    gen = _tpu_generation() if generation is None else generation

    # Deinterleave + pad ONCE for the whole flow.
    x3 = x.reshape(L, half, 2)
    x_even, x_odd = x3[:, :, 0], x3[:, :, 1]
    half_pad = coupling_params[0][0].shape[0]
    pad = half_pad - half
    x_even = jnp.pad(x_even, ((0, 0), (0, pad)))
    x_odd = jnp.pad(x_odd, ((0, 0), (0, pad)))

    for i, params in enumerate(coupling_params):
        if i % 2:   # mask_config=1: transform the even half with MLP(odd)
            x_even = _run_coupling_mlp(x_odd, x_even, params, False,
                                       generation=gen)
        else:       # mask_config=0: transform the odd half with MLP(even)
            x_odd = _run_coupling_mlp(x_even, x_odd, params, False,
                                      generation=gen)

    y = jnp.stack((x_even[:, :half], x_odd[:, :half]), axis=2).reshape(L, W)
    z, ldj_scale = scaling_forward(y, scale_param, reverse=False)
    return z, ldj_scale      # additive couplings are volume-preserving


def nice_f_inverse(z, coupling_params, scale_param, generation=None):
    """NICE.f_inverse : Z -> X."""
    L, W = z.shape
    half = W // 2
    gen = _tpu_generation() if generation is None else generation

    x, _ = scaling_forward(z, scale_param, reverse=True)
    x3 = x.reshape(L, half, 2)
    x_even, x_odd = x3[:, :, 0], x3[:, :, 1]
    half_pad = coupling_params[0][0].shape[0]
    pad = half_pad - half
    x_even = jnp.pad(x_even, ((0, 0), (0, pad)))
    x_odd = jnp.pad(x_odd, ((0, 0), (0, pad)))

    for i in reversed(range(len(coupling_params))):
        params = coupling_params[i]
        if i % 2:
            x_even = _run_coupling_mlp(x_odd, x_even, params, True,
                                       generation=gen)
        else:
            x_odd = _run_coupling_mlp(x_even, x_odd, params, True,
                                      generation=gen)
    return jnp.stack((x_even[:, :half], x_odd[:, :half]), axis=2).reshape(L, W)


def nice_forward(x, mu, sig, coupling_params, scale_param, generation=None):
    """Port of NICE.forward / NICE.log_prob: returns (z, log-likelihood)."""
    L, W = x.shape
    z, log_det_J = nice_f(x, coupling_params, scale_param, generation)
    log_det_J = log_det_J - jnp.log(256.0) * W
    log_ll = jnp.sum(_normal_log_prob(z, mu, sig), axis=1)
    return z, log_ll + log_det_J


# --------------------------------------------------------------------------
# Demo + correctness checks.
# --------------------------------------------------------------------------
if __name__ == "__main__":
    # Small config consistent with the module: L=8 samples, in_out_dim=16,
    # mid_dim=32, 3 hidden layers per coupling MLP, 4 coupling layers.
    L, in_out_dim, mid_dim, hidden, n_coupling = 8, 16, 32, 3, 4

    key = jax.random.PRNGKey(0)
    k_x, key = jax.random.split(key)
    x = jax.random.normal(k_x, (L, in_out_dim), jnp.float32)
    mu, sig = jnp.float32(0.0), jnp.float32(1.0)

    raw_layers = []
    for _ in range(n_coupling):
        key, kl = jax.random.split(key)
        raw_layers.append(init_coupling_params(kl, in_out_dim, mid_dim, hidden))
    scale_param = jnp.zeros((1, in_out_dim), jnp.float32)   # PyTorch init

    prepped = [prepare_coupling_params(p) for p in raw_layers]

    # ---- full NICE forward: couplings in Pallas, split layout end-to-end ----
    z, log_ll = nice_forward(x, mu, sig, prepped, scale_param)
    z = jax.block_until_ready(z)
    log_ll = jax.block_until_ready(log_ll)
    assert z.shape == (L, in_out_dim) and log_ll.shape == (L,)

    # ---- single AdditiveCoupling layer: reference + exact invertibility ----
    def ref_coupling(xin, raw_params, mask_config, reverse):
        Lr, Wr = xin.shape
        x3 = xin.reshape(Lr, Wr // 2, 2)
        if mask_config:
            x1r, x2r = x3[:, :, 1], x3[:, :, 0]
        else:
            x1r, x2r = x3[:, :, 0], x3[:, :, 1]
        h = x1r
        n = len(raw_params) // 2
        for i in range(n):
            h = h @ raw_params[2 * i] + raw_params[2 * i + 1]
            if i < n - 1:
                h = jnp.maximum(h, 0.0)
        y2r = x2r - h if reverse else x2r + h
        if mask_config:
            outr = jnp.stack((y2r, x1r), axis=2)
        else:
            outr = jnp.stack((x1r, y2r), axis=2)
        return outr.reshape(Lr, Wr)

    y0, ldj0 = additive_coupling_forward(x, jnp.zeros(()), prepped[0],
                                         mask_config=0, reverse=False)
    y0 = jax.block_until_ready(y0)
    y0_ref = ref_coupling(x, raw_layers[0], 0, False)
    assert float(jnp.max(jnp.abs(y0 - y0_ref))) < 5e-2          # bf16 MXU tol
    x0_rec, _ = additive_coupling_forward(y0, ldj0, prepped[0],
                                          mask_config=0, reverse=True)
    x0_rec = jax.block_until_ready(x0_rec)
    assert float(jnp.max(jnp.abs(x0_rec - x))) < 1e-5            # exact inverse

    # ---- full-flow invertibility (bf16 t recomputed on the scaling-roundtrip
    #      perturbed passthrough -> small but nonzero tolerance) ----
    x_rec = jax.block_until_ready(nice_f_inverse(z, prepped, scale_param))
    assert float(jnp.max(jnp.abs(x_rec - x))) < 5e-2

    # ---- full model vs pure-JAX f32 reference (loose: bf16 MXU operands) ----
    def ref_nice_forward(xin, layers, scale_p):
        h = xin
        for i, rp in enumerate(layers):
            h = ref_coupling(h, rp, i % 2, False)
        scale = jnp.exp(scale_p) + 1e-5
        ldj = jnp.sum(scale) - jnp.log(256.0) * xin.shape[1]
        zr = h * jnp.exp(scale)
        llr = jnp.sum(_normal_log_prob(zr, mu, sig), axis=1) + ldj
        return zr, llr

    z_ref, ll_ref = ref_nice_forward(x, raw_layers, scale_param)
    assert float(jnp.max(jnp.abs(z - z_ref))) < 0.25
    assert float(jnp.max(jnp.abs(log_ll - ll_ref)
                         / (jnp.abs(ll_ref) + 1.0))) < 0.05

    print("KERNEL_OK")
</pallas_src>

<mosaic_0001>
module attributes {stable_mosaic.version = 11 : i64} {
  func.func @_coupling_kernel(%arg0: i32, %arg1: memref<8x128xf32, #tpu.memory_space<vmem>>, %arg2: memref<8x128xf32, #tpu.memory_space<vmem>>, %arg3: memref<128x128xbf16, #tpu.memory_space<vmem>>, %arg4: memref<1x128xf32, #tpu.memory_space<vmem>>, %arg5: memref<128x128xbf16, #tpu.memory_space<vmem>>, %arg6: memref<1x128xf32, #tpu.memory_space<vmem>>, %arg7: memref<128x128xbf16, #tpu.memory_space<vmem>>, %arg8: memref<1x128xf32, #tpu.memory_space<vmem>>, %arg9: memref<128x128xbf16, #tpu.memory_space<vmem>>, %arg10: memref<1x128xf32, #tpu.memory_space<vmem>>, %arg11: memref<8x128xf32, #tpu.memory_space<vmem>>) attributes {dimension_semantics = [#tpu.dimension_semantics<parallel>], iteration_bounds = array<i64: 1>, scalar_prefetch = 0 : i64, scratch_operands = 0 : i64, tpu.core_type = #tpu.core_type<tc>, window_params = [{transform_indices = @transform_0, window_bounds = array<i64: 8, 128>}, {transform_indices = @transform_1, window_bounds = array<i64: 8, 128>}, {pipeline_mode = #tpu.pipeline_mode<synchronous>, transform_indices = @transform_2, window_bounds = array<i64: 128, 128>}, {pipeline_mode = #tpu.pipeline_mode<synchronous>, transform_indices = @transform_3, window_bounds = array<i64: 1, 128>}, {pipeline_mode = #tpu.pipeline_mode<synchronous>, transform_indices = @transform_4, window_bounds = array<i64: 128, 128>}, {pipeline_mode = #tpu.pipeline_mode<synchronous>, transform_indices = @transform_5, window_bounds = array<i64: 1, 128>}, {pipeline_mode = #tpu.pipeline_mode<synchronous>, transform_indices = @transform_6, window_bounds = array<i64: 128, 128>}, {pipeline_mode = #tpu.pipeline_mode<synchronous>, transform_indices = @transform_7, window_bounds = array<i64: 1, 128>}, {pipeline_mode = #tpu.pipeline_mode<synchronous>, transform_indices = @transform_8, window_bounds = array<i64: 128, 128>}, {pipeline_mode = #tpu.pipeline_mode<synchronous>, transform_indices = @transform_9, window_bounds = array<i64: 1, 128>}, {transform_indices = @transform_10, window_bounds = array<i64: 8, 128>}]} {
    %c0 = arith.constant 0 : index
    %c0_0 = arith.constant 0 : index
    %0 = vector.load %arg1[%c0, %c0_0] : memref<8x128xf32, #tpu.memory_space<vmem>>, vector<8x128xf32>
    %c0_1 = arith.constant 0 : index
    %c0_2 = arith.constant 0 : index
    %1 = vector.load %arg3[%c0_1, %c0_2] : memref<128x128xbf16, #tpu.memory_space<vmem>>, vector<128x128xbf16>
    %c0_3 = arith.constant 0 : index
    %c0_4 = arith.constant 0 : index
    %2 = vector.load %arg4[%c0_3, %c0_4] : memref<1x128xf32, #tpu.memory_space<vmem>>, vector<1x128xf32>
    %3 = arith.truncf %0 : vector<8x128xf32> to vector<8x128xbf16>
    %cst = arith.constant dense<0.000000e+00> : vector<8x128xf32>
    %4 = tpu.matmul %3, %1, %cst {dimension_numbers = #tpu.dot_dimension_numbers<[1], [0], [0], [1], [0, 0, 1, 1], [], []>} : vector<8x128xbf16>, vector<128x128xbf16>, vector<8x128xf32> -> vector<8x128xf32>
    %5 = vector.broadcast %2 : vector<1x128xf32> to vector<8x128xf32>
    %6 = arith.addf %4, %5 : vector<8x128xf32>
    %cst_5 = arith.constant 0.000000e+00 : f32
    %7 = vector.broadcast %cst_5 : f32 to vector<8x128xf32>
    %8 = arith.maximumf %6, %7 : vector<8x128xf32>
    %9 = arith.truncf %8 : vector<8x128xf32> to vector<8x128xbf16>
    %c0_6 = arith.constant 0 : index
    %c0_7 = arith.constant 0 : index
    %10 = vector.load %arg5[%c0_6, %c0_7] : memref<128x128xbf16, #tpu.memory_space<vmem>>, vector<128x128xbf16>
    %c0_8 = arith.constant 0 : index
    %c0_9 = arith.constant 0 : index
    %11 = vector.load %arg6[%c0_8, %c0_9] : memref<1x128xf32, #tpu.memory_space<vmem>>, vector<1x128xf32>
    %cst_10 = arith.constant dense<0.000000e+00> : vector<8x128xf32>
    %12 = tpu.matmul %9, %10, %cst_10 {dimension_numbers = #tpu.dot_dimension_numbers<[1], [0], [0], [1], [0, 0, 1, 1], [], []>} : vector<8x128xbf16>, vector<128x128xbf16>, vector<8x128xf32> -> vector<8x128xf32>
    %13 = vector.broadcast %11 : vector<1x128xf32> to vector<8x128xf32>
    %14 = arith.addf %12, %13 : vector<8x128xf32>
    %cst_11 = arith.constant 0.000000e+00 : f32
    %15 = vector.broadcast %cst_11 : f32 to vector<8x128xf32>
    %16 = arith.maximumf %14, %15 : vector<8x128xf32>
    %17 = arith.truncf %16 : vector<8x128xf32> to vector<8x128xbf16>
    %c0_12 = arith.constant 0 : index
    %c0_13 = arith.constant 0 : index
    %18 = vector.load %arg7[%c0_12, %c0_13] : memref<128x128xbf16, #tpu.memory_space<vmem>>, vector<128x128xbf16>
    %c0_14 = arith.constant 0 : index
    %c0_15 = arith.constant 0 : index
    %19 = vector.load %arg8[%c0_14, %c0_15] : memref<1x128xf32, #tpu.memory_space<vmem>>, vector<1x128xf32>
    %cst_16 = arith.constant dense<0.000000e+00> : vector<8x128xf32>
    %20 = tpu.matmul %17, %18, %cst_16 {dimension_numbers = #tpu.dot_dimension_numbers<[1], [0], [0], [1], [0, 0, 1, 1], [], []>} : vector<8x128xbf16>, vector<128x128xbf16>, vector<8x128xf32> -> vector<8x128xf32>
    %21 = vector.broadcast %19 : vector<1x128xf32> to vector<8x128xf32>
    %22 = arith.addf %20, %21 : vector<8x128xf32>
    %cst_17 = arith.constant 0.000000e+00 : f32
    %23 = vector.broadcast %cst_17 : f32 to vector<8x128xf32>
    %24 = arith.maximumf %22, %23 : vector<8x128xf32>
    %25 = arith.truncf %24 : vector<8x128xf32> to vector<8x128xbf16>
    %c0_18 = arith.constant 0 : index
    %c0_19 = arith.constant 0 : index
    %26 = vector.load %arg9[%c0_18, %c0_19] : memref<128x128xbf16, #tpu.memory_space<vmem>>, vector<128x128xbf16>
    %c0_20 = arith.constant 0 : index
    %c0_21 = arith.constant 0 : index
    %27 = vector.load %arg10[%c0_20, %c0_21] : memref<1x128xf32, #tpu.memory_space<vmem>>, vector<1x128xf32>
    %cst_22 = arith.constant dense<0.000000e+00> : vector<8x128xf32>
    %28 = tpu.matmul %25, %26, %cst_22 {dimension_numbers = #tpu.dot_dimension_numbers<[1], [0], [0], [1], [0, 0, 1, 1], [], []>} : vector<8x128xbf16>, vector<128x128xbf16>, vector<8x128xf32> -> vector<8x128xf32>
    %29 = vector.broadcast %27 : vector<1x128xf32> to vector<8x128xf32>
    %30 = arith.addf %28, %29 : vector<8x128xf32>
    %c0_23 = arith.constant 0 : index
    %c0_24 = arith.constant 0 : index
    %31 = vector.load %arg2[%c0_23, %c0_24] : memref<8x128xf32, #tpu.memory_space<vmem>>, vector<8x128xf32>
    %32 = arith.addf %31, %30 : vector<8x128xf32>
    %c0_25 = arith.constant 0 : index
    %c0_26 = arith.constant 0 : index
    %33 = vector.load %arg11[%c0_25, %c0_26] : memref<8x128xf32, #tpu.memory_space<vmem>>, vector<8x128xf32>
    tpu.vector_store %arg11[%c0_25, %c0_26], %32 {strides = array<i32>} : memref<8x128xf32, #tpu.memory_space<vmem>>, vector<8x128xf32>,
    return
  }
  func.func @transform_0(%arg0: i32) -> (i32, i32) {
    %c0_i32 = arith.constant 0 : i32
    %c0_i32_0 = arith.constant 0 : i32
    return %arg0, %c0_i32 : i32, i32
  }
  func.func @transform_1(%arg0: i32) -> (i32, i32) {
    %c0_i32 = arith.constant 0 : i32
    %c0_i32_0 = arith.constant 0 : i32
    return %arg0, %c0_i32 : i32, i32
  }
  func.func @transform_2(%arg0: i32) -> (i32, i32) {
    %c0_i32 = arith.constant 0 : i32
    %c0_i32_0 = arith.constant 0 : i32
    %c0_i32_1 = arith.constant 0 : i32
    return %c0_i32, %c0_i32_0 : i32, i32
  }
  func.func @transform_3(%arg0: i32) -> (i32, i32) {
    %c0_i32 = arith.constant 0 : i32
    %c0_i32_0 = arith.constant 0 : i32
    %c0_i32_1 = arith.constant 0 : i32
    return %c0_i32, %c0_i32_0 : i32, i32
  }
  func.func @transform_4(%arg0: i32) -> (i32, i32) {
    %c0_i32 = arith.constant 0 : i32
    %c0_i32_0 = arith.constant 0 : i32
    %c0_i32_1 = arith.constant 0 : i32
    return %c0_i32, %c0_i32_0 : i32, i32
  }
  func.func @transform_5(%arg0: i32) -> (i32, i32) {
    %c0_i32 = arith.constant 0 : i32
    %c0_i32_0 = arith.constant 0 : i32
    %c0_i32_1 = arith.constant 0 : i32
    return %c0_i32, %c0_i32_0 : i32, i32
  }
  func.func @transform_6(%arg0: i32) -> (i32, i32) {
    %c0_i32 = arith.constant 0 : i32
    %c0_i32_0 = arith.constant 0 : i32
    %c0_i32_1 = arith.constant 0 : i32
    return %c0_i32, %c0_i32_0 : i32, i32
  }
  func.func @transform_7(%arg0: i32) -> (i32, i32) {
    %c0_i32 = arith.constant 0 : i32
    %c0_i32_0 = arith.constant 0 : i32
    %c0_i32_1 = arith.constant 0 : i32
    return %c0_i32, %c0_i32_0 : i32, i32
  }
  func.func @transform_8(%arg0: i32) -> (i32, i32) {
    %c0_i32 = arith.constant 0 : i32
    %c0_i32_0 = arith.constant 0 : i32
    %c0_i32_1 = arith.constant 0 : i32
    return %c0_i32, %c0_i32_0 : i32, i32
  }
  func.func @transform_9(%arg0: i32) -> (i32, i32) {
    %c0_i32 = arith.constant 0 : i32
    %c0_i32_0 = arith.constant 0 : i32
    %c0_i32_1 = arith.constant 0 : i32
    return %c0_i32, %c0_i32_0 : i32, i32
  }
  func.func @transform_10(%arg0: i32) -> (i32, i32) {
    %c0_i32 = arith.constant 0 : i32
    %c0_i32_0 = arith.constant 0 : i32
    return %arg0, %c0_i32 : i32, i32
  }
}

module attributes {stable_mosaic.version = 11 : i64} {
  func.func @_coupling_kernel(%arg0: i32, %arg1: memref<8x128xf32, #tpu.memory_space<vmem>>, %arg2: memref<8x128xf32, #tpu.memory_space<vmem>>, %arg3: memref<128x128xbf16, #tpu.memory_space<vmem>>, %arg4: memref<1x128xf32, #tpu.memory_space<vmem>>, %arg5: memref<128x128xbf16, #tpu.memory_space<vmem>>, %arg6: memref<1x128xf32, #tpu.memory_space<vmem>>, %arg7: memref<128x128xbf16, #tpu.memory_space<vmem>>, %arg8: memref<1x128xf32, #tpu.memory_space<vmem>>, %arg9: memref<128x128xbf16, #tpu.memory_space<vmem>>, %arg10: memref<1x128xf32, #tpu.memory_space<vmem>>, %arg11: memref<8x128xf32, #tpu.memory_space<vmem>>) attributes {dimension_semantics = [#tpu.dimension_semantics<parallel>], iteration_bounds = array<i64: 1>, scalar_prefetch = 0 : i64, scratch_operands = 0 : i64, tpu.core_type = #tpu.core_type<tc>, window_params = [{transform_indices = @transform_0, window_bounds = array<i64: 8, 128>}, {transform_indices = @transform_1, window_bounds = array<i64: 8, 128>}, {pipeline_mode = #tpu.pipeline_mode<synchronous>, transform_indices = @transform_2, window_bounds = array<i64: 128, 128>}, {pipeline_mode = #tpu.pipeline_mode<synchronous>, transform_indices = @transform_3, window_bounds = array<i64: 1, 128>}, {pipeline_mode = #tpu.pipeline_mode<synchronous>, transform_indices = @transform_4, window_bounds = array<i64: 128, 128>}, {pipeline_mode = #tpu.pipeline_mode<synchronous>, transform_indices = @transform_5, window_bounds = array<i64: 1, 128>}, {pipeline_mode = #tpu.pipeline_mode<synchronous>, transform_indices = @transform_6, window_bounds = array<i64: 128, 128>}, {pipeline_mode = #tpu.pipeline_mode<synchronous>, transform_indices = @transform_7, window_bounds = array<i64: 1, 128>}, {pipeline_mode = #tpu.pipeline_mode<synchronous>, transform_indices = @transform_8, window_bounds = array<i64: 128, 128>}, {pipeline_mode = #tpu.pipeline_mode<synchronous>, transform_indices = @transform_9, window_bounds = array<i64: 1, 128>}, {transform_indices = @transform_10, window_bounds = array<i64: 8, 128>}]} {
    %c0 = arith.constant 0 : index
    %c0_0 = arith.constant 0 : index
    %0 = vector.load %arg1[%c0, %c0_0] : memref<8x128xf32, #tpu.memory_space<vmem>>, vector<8x128xf32>
    %c0_1 = arith.constant 0 : index
    %c0_2 = arith.constant 0 : index
    %1 = vector.load %arg3[%c0_1, %c0_2] : memref<128x128xbf16, #tpu.memory_space<vmem>>, vector<128x128xbf16>
    %c0_3 = arith.constant 0 : index
    %c0_4 = arith.constant 0 : index
    %2 = vector.load %arg4[%c0_3, %c0_4] : memref<1x128xf32, #tpu.memory_space<vmem>>, vector<1x128xf32>
    %3 = arith.truncf %0 : vector<8x128xf32> to vector<8x128xbf16>
    %cst = arith.constant dense<0.000000e+00> : vector<8x128xf32>
    %4 = tpu.matmul %3, %1, %cst {dimension_numbers = #tpu.dot_dimension_numbers<[1], [0], [0], [1], [0, 0, 1, 1], [], []>} : vector<8x128xbf16>, vector<128x128xbf16>, vector<8x128xf32> -> vector<8x128xf32>
    %5 = vector.broadcast %2 : vector<1x128xf32> to vector<8x128xf32>
    %6 = arith.addf %4, %5 : vector<8x128xf32>
    %cst_5 = arith.constant 0.000000e+00 : f32
    %7 = vector.broadcast %cst_5 : f32 to vector<8x128xf32>
    %8 = arith.maximumf %6, %7 : vector<8x128xf32>
    %9 = arith.truncf %8 : vector<8x128xf32> to vector<8x128xbf16>
    %c0_6 = arith.constant 0 : index
    %c0_7 = arith.constant 0 : index
    %10 = vector.load %arg5[%c0_6, %c0_7] : memref<128x128xbf16, #tpu.memory_space<vmem>>, vector<128x128xbf16>
    %c0_8 = arith.constant 0 : index
    %c0_9 = arith.constant 0 : index
    %11 = vector.load %arg6[%c0_8, %c0_9] : memref<1x128xf32, #tpu.memory_space<vmem>>, vector<1x128xf32>
    %cst_10 = arith.constant dense<0.000000e+00> : vector<8x128xf32>
    %12 = tpu.matmul %9, %10, %cst_10 {dimension_numbers = #tpu.dot_dimension_numbers<[1], [0], [0], [1], [0, 0, 1, 1], [], []>} : vector<8x128xbf16>, vector<128x128xbf16>, vector<8x128xf32> -> vector<8x128xf32>
    %13 = vector.broadcast %11 : vector<1x128xf32> to vector<8x128xf32>
    %14 = arith.addf %12, %13 : vector<8x128xf32>
    %cst_11 = arith.constant 0.000000e+00 : f32
    %15 = vector.broadcast %cst_11 : f32 to vector<8x128xf32>
    %16 = arith.maximumf %14, %15 : vector<8x128xf32>
    %17 = arith.truncf %16 : vector<8x128xf32> to vector<8x128xbf16>
    %c0_12 = arith.constant 0 : index
    %c0_13 = arith.constant 0 : index
    %18 = vector.load %arg7[%c0_12, %c0_13] : memref<128x128xbf16, #tpu.memory_space<vmem>>, vector<128x128xbf16>
    %c0_14 = arith.constant 0 : index
    %c0_15 = arith.constant 0 : index
    %19 = vector.load %arg8[%c0_14, %c0_15] : memref<1x128xf32, #tpu.memory_space<vmem>>, vector<1x128xf32>
    %cst_16 = arith.constant dense<0.000000e+00> : vector<8x128xf32>
    %20 = tpu.matmul %17, %18, %cst_16 {dimension_numbers = #tpu.dot_dimension_numbers<[1], [0], [0], [1], [0, 0, 1, 1], [], []>} : vector<8x128xbf16>, vector<128x128xbf16>, vector<8x128xf32> -> vector<8x128xf32>
    %21 = vector.broadcast %19 : vector<1x128xf32> to vector<8x128xf32>
    %22 = arith.addf %20, %21 : vector<8x128xf32>
    %cst_17 = arith.constant 0.000000e+00 : f32
    %23 = vector.broadcast %cst_17 : f32 to vector<8x128xf32>
    %24 = arith.maximumf %22, %23 : vector<8x128xf32>
    %25 = arith.truncf %24 : vector<8x128xf32> to vector<8x128xbf16>
    %c0_18 = arith.constant 0 : index
    %c0_19 = arith.constant 0 : index
    %26 = vector.load %arg9[%c0_18, %c0_19] : memref<128x128xbf16, #tpu.memory_space<vmem>>, vector<128x128xbf16>
    %c0_20 = arith.constant 0 : index
    %c0_21 = arith.constant 0 : index
    %27 = vector.load %arg10[%c0_20, %c0_21] : memref<1x128xf32, #tpu.memory_space<vmem>>, vector<1x128xf32>
    %cst_22 = arith.constant dense<0.000000e+00> : vector<8x128xf32>
    %28 = tpu.matmul %25, %26, %cst_22 {dimension_numbers = #tpu.dot_dimension_numbers<[1], [0], [0], [1], [0, 0, 1, 1], [], []>} : vector<8x128xbf16>, vector<128x128xbf16>, vector<8x128xf32> -> vector<8x128xf32>
    %29 = vector.broadcast %27 : vector<1x128xf32> to vector<8x128xf32>
    %30 = arith.addf %28, %29 : vector<8x128xf32>
    %c0_23 = arith.constant 0 : index
    %c0_24 = arith.constant 0 : index
    %31 = vector.load %arg2[%c0_23, %c0_24] : memref<8x128xf32, #tpu.memory_space<vmem>>, vector<8x128xf32>
    %32 = arith.addf %31, %30 : vector<8x128xf32>
    %c0_25 = arith.constant 0 : index
    %c0_26 = arith.constant 0 : index
    %33 = vector.load %arg11[%c0_25, %c0_26] : memref<8x128xf32, #tpu.memory_space<vmem>>, vector<8x128xf32>
    tpu.vector_store %arg11[%c0_25, %c0_26], %32 {strides = array<i32>} : memref<8x128xf32, #tpu.memory_space<vmem>>, vector<8x128xf32>,
    return
  }
  func.func @transform_0(%arg0: i32) -> (i32, i32) {
    %c0_i32 = arith.constant 0 : i32
    %c0_i32_0 = arith.constant 0 : i32
    return %arg0, %c0_i32 : i32, i32
  }
  func.func @transform_1(%arg0: i32) -> (i32, i32) {
    %c0_i32 = arith.constant 0 : i32
    %c0_i32_0 = arith.constant 0 : i32
    return %arg0, %c0_i32 : i32, i32
  }
  func.func @transform_2(%arg0: i32) -> (i32, i32) {
    %c0_i32 = arith.constant 0 : i32
    %c0_i32_0 = arith.constant 0 : i32
    %c0_i32_1 = arith.constant 0 : i32
    return %c0_i32, %c0_i32_0 : i32, i32
  }
  func.func @transform_3(%arg0: i32) -> (i32, i32) {
    %c0_i32 = arith.constant 0 : i32
    %c0_i32_0 = arith.constant 0 : i32
    %c0_i32_1 = arith.constant 0 : i32
    return %c0_i32, %c0_i32_0 : i32, i32
  }
  func.func @transform_4(%arg0: i32) -> (i32, i32) {
    %c0_i32 = arith.constant 0 : i32
    %c0_i32_0 = arith.constant 0 : i32
    %c0_i32_1 = arith.constant 0 : i32
    return %c0_i32, %c0_i32_0 : i32, i32
  }
  func.func @transform_5(%arg0: i32) -> (i32, i32) {
    %c0_i32 = arith.constant 0 : i32
    %c0_i32_0 = arith.constant 0 : i32
    %c0_i32_1 = arith.constant 0 : i32
    return %c0_i32, %c0_i32_0 : i32, i32
  }
  func.func @transform_6(%arg0: i32) -> (i32, i32) {
    %c0_i32 = arith.constant 0 : i32
    %c0_i32_0 = arith.constant 0 : i32
    %c0_i32_1 = arith.constant 0 : i32
    return %c0_i32, %c0_i32_0 : i32, i32
  }
  func.func @transform_7(%arg0: i32) -> (i32, i32) {
    %c0_i32 = arith.constant 0 : i32
    %c0_i32_0 = arith.constant 0 : i32
    %c0_i32_1 = arith.constant 0 : i32
    return %c0_i32, %c0_i32_0 : i32, i32
  }
  func.func @transform_8(%arg0: i32) -> (i32, i32) {
    %c0_i32 = arith.constant 0 : i32
    %c0_i32_0 = arith.constant 0 : i32
    %c0_i32_1 = arith.constant 0 : i32
    return %c0_i32, %c0_i32_0 : i32, i32
  }
  func.func @transform_9(%arg0: i32) -> (i32, i32) {
    %c0_i32 = arith.constant 0 : i32
    %c0_i32_0 = arith.constant 0 : i32
    %c0_i32_1 = arith.constant 0 : i32
    return %c0_i32, %c0_i32_0 : i32, i32
  }
  func.func @transform_10(%arg0: i32) -> (i32, i32) {
    %c0_i32 = arith.constant 0 : i32
    %c0_i32_0 = arith.constant 0 : i32
    return %arg0, %c0_i32 : i32, i32
  }
}

</mosaic_0001>

<bundles_post_ra>
// kernel: tpu_custom_call.1
= control target key start
LH: loop header
LB: loop body
LE: loop exit
PB: predicated region body
PF: predicated region fallthrough
CT: control target
= control target key end

     0   :  { %15 = vsyncpa [#allocation3], 0  ;;  %s1161_s0 = inlined_call_operand.hbm [shape: f32[8,128], index: 0, kind: input, shape index: {}]   ;;  %s1162_s1 = inlined_call_operand.hbm [shape: f32[8,128], index: 1, kind: input, shape index: {}]   ;;  %s1163_s2 = inlined_call_operand.hbm [shape: bf16[128,128], index: 2, kind: input, shape index: {}]   ;;  %s1164_s3 = inlined_call_operand.vmem [shape: f32[1,128], index: 3, kind: input, shape index: {}]   ;;  %s1165_s4 = inlined_call_operand.hbm [shape: bf16[128,128], index: 4, kind: input, shape index: {}]   ;;  %s1166_s5 = inlined_call_operand.vmem [shape: f32[1,128], index: 5, kind: input, shape index: {}]   ;;  %s1167_s6 = inlined_call_operand.hbm [shape: bf16[128,128], index: 6, kind: input, shape index: {}]   ;;  %s1168_s7 = inlined_call_operand.vmem [shape: f32[1,128], index: 7, kind: input, shape index: {}]   ;;  %s1169_s8 = inlined_call_operand.hbm [shape: bf16[128,128], index: 8, kind: input, shape index: {}]   ;;  %s1170_s9 = inlined_call_operand.vmem [shape: f32[1,128], index: 9, kind: input, shape index: {}]   ;;  %s1171_s10 = inlined_call_operand.hbm [shape: f32[8,128], index: 10, kind: output, shape index: {}]  }
   0x1   :  { %16 = vsyncpa [#allocation6], 0 }
   0x2   :  { %17 = vsyncpa [#allocation9], 0 }
   0x3   :  { %18 = vsyncpa [#allocation12], 0 }
   0x4   :  { %19 = vsyncpa [#allocation4], 0  ;;  %s947_s13 = smov [#allocation5]   ;;  %s783_s17 = scalar_lea.hbm %s1162_s1, 128 }
   0x5   :  { %s36_s14 = sshll.u32 %s947_s13, 4  ;;  %p784_p0 = scmp.ne.s32.totalorder %s1162_s1, %s783_s17  ;;  %s37_s14 = int_to_ptr.vmem [resolvable:$true] %s36_s14 }
   0x6   :  { %p787_p1 = scmp.lt.u32.totalorder %s783_s17, %s1162_s1 }
   0x8   :  { %p789_p2 = pnand %p787_p1, %p784_p0 }
   0xa   :  { %792 = shalt.err (!%p789_p2)
}
   0xb   :  { %s793_s22 = scalar_lea.vmem %s37_s14, 128  ;;  %p798_p4 = scmp.lt.s32.totalorder %s37_s14, %s37_s14 }
   0xc   :  { %p794_p3 = scmp.ne.s32.totalorder %s37_s14, %s793_s22  ;;  %p799_p5 = scmp.lt.s32.totalorder %s793_s22, %s793_s22 }
   0xe   :  { %p800_p6 = por %p799_p5, %p798_p4 }
  0x10   :  { %p801_p7 = pnand %p800_p6, %p794_p3 }
  0x12   :  { %804 = shalt.err (!%p801_p7)
}
  0x13   :  { %39 = dma.hbm_to_vmem [thread:$0]  %s1162_s1, 128, %s37_s14, [#allocation6]  }
  0x14   :  { %s948_s25 = smov [#allocation8]   ;;  %s949_s27 = smov [#allocation2]  }
  0x15   :  { %s59_s26 = sshll.u32 %s948_s25, 4  ;;  %s26_s28 = sshll.u32 %s949_s27, 4  ;;  %s60_s26 = int_to_ptr.vmem [resolvable:$true] %s59_s26  ;;  %s27_s28 = int_to_ptr.vmem [resolvable:$true] %s26_s28 }
  0x16   :  { %s805_s11 = scalar_lea.hbm %s1165_s4, 1024 }
  0x17   :  { %p806_p8 = scmp.ne.s32.totalorder %s1165_s4, %s805_s11  ;;  %p809_p9 = scmp.lt.u32.totalorder %s805_s11, %s1165_s4 }
  0x19   :  { %p811_p10 = pnand %p809_p9, %p806_p8 }
  0x1b   :  { %814 = shalt.err (!%p811_p10)
}
  0x1c   :  { %s815_s1 = scalar_lea.vmem %s60_s26, 1024  ;;  %p820_p12 = scmp.lt.s32.totalorder %s60_s26, %s60_s26 }
  0x1d   :  { %p816_p11 = scmp.ne.s32.totalorder %s60_s26, %s815_s1  ;;  %p821_p13 = scmp.lt.s32.totalorder %s815_s1, %s815_s1 }
  0x1f   :  { %p822_p0 = por %p821_p13, %p820_p12 }
  0x21   :  { %p823_p1 = pnand %p822_p0, %p816_p11 }
  0x23   :  { %826 = shalt.err (!%p823_p1)
}
  0x24   :  { %s950_s14 = smov 64   ;;  %s951_s17 = smov 4  }
  0x25   :  { %65 = dma.hbm_to_vmem [thread:$0]  %s1165_s4, 1024, %s60_s26, [#allocation9], %s950_s14, %s950_s14, %s951_s17  }
  0x26   :  { %s827_s22 = scalar_lea.hbm %s1161_s0, 128 }
  0x27   :  { %p828_p2 = scmp.ne.s32.totalorder %s1161_s0, %s827_s22  ;;  %p831_p3 = scmp.lt.u32.totalorder %s827_s22, %s1161_s0 }
  0x29   :  { %p833_p4 = pnand %p831_p3, %p828_p2 }
  0x2b   :  { %836 = shalt.err (!%p833_p4)
}
  0x2c   :  { %s837_s29 = scalar_lea.vmem %s27_s28, 128  ;;  %p842_p6 = scmp.lt.s32.totalorder %s27_s28, %s27_s28 }
  0x2d   :  { %p838_p5 = scmp.ne.s32.totalorder %s27_s28, %s837_s29  ;;  %p843_p7 = scmp.lt.s32.totalorder %s837_s29, %s837_s29 }
  0x2f   :  { %p844_p8 = por %p843_p7, %p842_p6 }
  0x31   :  { %p845_p9 = pnand %p844_p8, %p838_p5 }
  0x33   :  { %848 = shalt.err (!%p845_p9)
}
  0x34   :  { %29 = dma.hbm_to_vmem [thread:$0]  %s1161_s0, 128, %s27_s28, [#allocation3]  }
  0x35   :  { %s952_s30 = smov [#allocation7]   ;;  %s953_s12 = smov [#allocation10]  }
  0x36   :  { %s45_s11 = sshll.u32 %s952_s30, 4  ;;  %s73_s13 = sshll.u32 %s953_s12, 4  ;;  %s46_s11 = int_to_ptr.vmem [resolvable:$true] %s45_s11  ;;  %s74_s13 = int_to_ptr.vmem [resolvable:$true] %s73_s13 }
  0x37   :  { %s849_s1 = scalar_lea.hbm %s1163_s2, 1024 }
  0x38   :  { %p850_p10 = scmp.ne.s32.totalorder %s1163_s2, %s849_s1  ;;  %p853_p11 = scmp.lt.u32.totalorder %s849_s1, %s1163_s2 }
  0x3a   :  { %p855_p12 = pnand %p853_p11, %p850_p10 }
  0x3c   :  { %858 = shalt.err (!%p855_p12)
}
  0x3d   :  { %s859_s0 = scalar_lea.vmem %s46_s11, 1024  ;;  %p864_p0 = scmp.lt.s32.totalorder %s46_s11, %s46_s11 }
  0x3e   :  { %p860_p13 = scmp.ne.s32.totalorder %s46_s11, %s859_s0  ;;  %p865_p1 = scmp.lt.s32.totalorder %s859_s0, %s859_s0 }
  0x40   :  { %p866_p2 = por %p865_p1, %p864_p0 }
  0x42   :  { %p867_p3 = pnand %p866_p2, %p860_p13 }
  0x44   :  { %870 = shalt.err (!%p867_p3)
}
  0x45   :  { %51 = dma.hbm_to_vmem [thread:$0]  %s1163_s2, 1024, %s46_s11, [#allocation6], %s950_s14, %s950_s14, %s951_s17  }
  0x46   :  { %s871_s25 = scalar_lea.hbm %s1167_s6, 1024 }
  0x47   :  { %p872_p4 = scmp.ne.s32.totalorder %s1167_s6, %s871_s25  ;;  %p875_p5 = scmp.lt.u32.totalorder %s871_s25, %s1167_s6 }
  0x49   :  { %p877_p6 = pnand %p875_p5, %p872_p4 }
  0x4b   :  { %880 = shalt.err (!%p877_p6)
}
  0x4c   :  { %s881_s30 = scalar_lea.vmem %s74_s13, 1024  ;;  %p886_p8 = scmp.lt.s32.totalorder %s74_s13, %s74_s13 }
  0x4d   :  { %p882_p7 = scmp.ne.s32.totalorder %s74_s13, %s881_s30  ;;  %p887_p9 = scmp.lt.s32.totalorder %s881_s30, %s881_s30 }
  0x4f   :  { %p888_p10 = por %p887_p9, %p886_p8 }
  0x51   :  { %p889_p11 = pnand %p888_p10, %p882_p7 }
  0x53   :  { %892 = shalt.err (!%p889_p11)
}
  0x54   :  { %79 = dma.hbm_to_vmem [thread:$0]  %s1167_s6, 1024, %s74_s13, [#allocation9], %s950_s14, %s950_s14, %s951_s17  }
  0x55   :  { %s954_s12 = smov [#allocation11]   ;;  %s893_s18 = scalar_lea.hbm %s1169_s8, 1024 }
  0x56   :  { %s87_s15 = sshll.u32 %s954_s12, 4  ;;  %p894_p12 = scmp.ne.s32.totalorder %s1169_s8, %s893_s18  ;;  %s88_s15 = int_to_ptr.vmem [resolvable:$true] %s87_s15 }
  0x57   :  { %p897_p13 = scmp.lt.u32.totalorder %s893_s18, %s1169_s8 }
  0x59   :  { %p899_p0 = pnand %p897_p13, %p894_p12 }
  0x5b   :  { %902 = shalt.err (!%p899_p0)
}
  0x5c   :  { %s903_s28 = scalar_lea.vmem %s88_s15, 1024  ;;  %p908_p2 = scmp.lt.s32.totalorder %s88_s15, %s88_s15 }
  0x5d   :  { %p904_p1 = scmp.ne.s32.totalorder %s88_s15, %s903_s28  ;;  %p909_p3 = scmp.lt.s32.totalorder %s903_s28, %s903_s28 }
  0x5f   :  { %p910_p4 = por %p909_p3, %p908_p2 }
  0x61   :  { %p911_p5 = pnand %p910_p4, %p904_p1 }
  0x63   :  { %914 = shalt.err (!%p911_p5)
}
  0x64   :  { %93 = dma.hbm_to_vmem [thread:$0]  %s1169_s8, 1024, %s88_s15, [#allocation12], %s950_s14, %s950_s14, %s951_s17  }
  0x65   :  { %937 = dma.done.wait [#allocation3], 128  }
  0x66   :  { %938 = vsyncadd [#allocation3], 4294967168 }
  0x67   :  { %939 = dma.done.wait [#allocation6], 1152  }
  0x68   :  { %940 = vsyncadd [#allocation6], 4294966144 }
  0x69   :  { %941 = dma.done.wait [#allocation9], 2048  }
  0x6a   :  { %942 = vsyncadd [#allocation9], 4294965248 }
  0x6b   :  { %943 = dma.done.wait [#allocation12], 1024  }
  0x6c   :  { %944 = vsyncadd [#allocation12], 4294966272  ;;  %v955_v0 = vmov 0.0   ;;  %vm956_vm0 = vmmov 0   ;;  %v751_v1 = vld [vmem:[#allocation7] sm:$0xff]   ;;  %v752_v2 = vld [vmem:[#allocation7 + $0x8] sm:$0xff]  }
  0x6d   :  { %660 = vmatprep.subr.bf16.mxu0 %v955_v0  ;;  %676 = vmatprep.mubr.msk.bf16.mxu0 %vm956_vm0, %v955_v0  ;;  %v753_v3 = vld [vmem:[#allocation7 + $0x10] sm:$0xff]   ;;  %v759_v4 = vld [vmem:[#allocation8] sm:$0xff]   ;;  %v754_v5 = vld [vmem:[#allocation7 + $0x18] sm:$0xff]   ;;  %s957_s25 = smov [#allocation13]  }
  0x6e   :  { %680 = vmatprep.subr.bf16.mxu1 %v955_v0  ;;  %696 = vmatprep.mubr.msk.bf16.mxu1 %vm956_vm0, %v955_v0  ;;  %v760_v6 = vld [vmem:[#allocation8 + $0x8] sm:$0xff]   ;;  %v755_v7 = vld [vmem:[#allocation7 + $0x20] sm:$0xff]   ;;  %v761_v8 = vld [vmem:[#allocation8 + $0x10] sm:$0xff]   ;;  %s576_s27 = sshll.u32 %s957_s25, 4  ;;  %s577_s27 = int_to_ptr.vmem [resolvable:$true] %s576_s27 }
  0x6f   :  { %661 = vmatpush3.bf16.msra.mxu0 %v751_v1  ;;  %681 = vmatpush3.bf16.msra.mxu1 %v759_v4  ;;  %v756_v9 = vld [vmem:[#allocation7 + $0x28] sm:$0xff]   ;;  %v762_v10 = vld [vmem:[#allocation8 + $0x18] sm:$0xff]   ;;  %v757_v11 = vld [vmem:[#allocation7 + $0x30] sm:$0xff]   ;;  %p920_p7 = scmp.lt.s32.totalorder %s577_s27, %s577_s27 }
  0x70   :  { %662 = vmatprep.subr.bf16.mxu0 %v955_v0  ;;  %682 = vmatprep.subr.bf16.mxu1 %v955_v0  ;;  %v763_v12 = vld [vmem:[#allocation8 + $0x20] sm:$0xff]   ;;  %v758_v13 = vld [vmem:[#allocation7 + $0x38] sm:$0xff]   ;;  %v115_v14 = vld [vmem:[#allocation2] sm:$0xff] }
  0x71   :  { %v764_v15 = vld [vmem:[#allocation8 + $0x28] sm:$0xff]   ;;  %v133_v16 = vpack.c.bf16 %v115_v14, %v115_v14  ;;  %v765_v17 = vld [vmem:[#allocation8 + $0x30] sm:$0xff]   ;;  %v766_v18 = vld [vmem:[#allocation8 + $0x38] sm:$0xff]  }
  0x72   :  { %v767_v19 = vld [vmem:[#allocation10] sm:$0xff]   ;;  %v768_v20 = vld [vmem:[#allocation10 + $0x8] sm:$0xff]   ;;  %v769_v21 = vld [vmem:[#allocation10 + $0x10] sm:$0xff]  }
  0x73   :  { %663 = vmatpush3.bf16.msra.mxu0 %v752_v2  ;;  %683 = vmatpush3.bf16.msra.mxu1 %v760_v6  ;;  %v770_v22 = vld [vmem:[#allocation10 + $0x18] sm:$0xff]   ;;  %v771_v23 = vld [vmem:[#allocation10 + $0x20] sm:$0xff]   ;;  %v772_v24 = vld [vmem:[#allocation10 + $0x28] sm:$0xff]  }
  0x74   :  { %664 = vmatprep.subr.bf16.mxu0 %v955_v0  ;;  %684 = vmatprep.subr.bf16.mxu1 %v955_v0  ;;  %v588_v25 = vld [vmem:[%s1164_s3] ss:$0 sm:$0xff]  ;;  %v774_v34 = vld [vmem:[#allocation10 + $0x38] sm:$0xff]   ;;  %v775_v35 = vld [vmem:[#allocation11] sm:$0xff]  }
  0x75   :  { %v773_v33 = vld [vmem:[#allocation10 + $0x30] sm:$0xff]   ;;  %v776_v36 = vld [vmem:[#allocation11 + $0x8] sm:$0xff]   ;;  %v778_v38 = vld [vmem:[#allocation11 + $0x18] sm:$0xff]  }
  0x76   :  { %v777_v37 = vld [vmem:[#allocation11 + $0x10] sm:$0xff]   ;;  %v779_v39 = vld [vmem:[#allocation11 + $0x20] sm:$0xff]   ;;  %v780_v40 = vld [vmem:[#allocation11 + $0x28] sm:$0xff]  }
  0x77   :  { %665 = vmatpush3.bf16.msra.mxu0 %v753_v3  ;;  %685 = vmatpush3.bf16.msra.mxu1 %v761_v8  ;;  %v597_v41 = vld [vmem:[%s1166_s5] ss:$0 sm:$0xff]  ;;  %v782_v50 = vld [vmem:[#allocation11 + $0x38] sm:$0xff]  }
  0x78   :  { %666 = vmatprep.subr.bf16.mxu0 %v955_v0  ;;  %686 = vmatprep.subr.bf16.mxu1 %v955_v0  ;;  %v781_v49 = vld [vmem:[#allocation11 + $0x30] sm:$0xff]   ;;  %v567_v61 = vld [vmem:[#allocation5] sm:$0xff] }
  0x79   :  { %v606_v51 = vld [vmem:[%s1168_s7] ss:$0 sm:$0xff]  ;;  %s915_s7 = scalar_lea.vmem %s577_s27, 128 }
  0x7a   :  { %v615_v59 = vld [vmem:[%s1170_s9] ss:$0 sm:$0xff]  ;;  %p916_p6 = scmp.ne.s32.totalorder %s577_s27, %s915_s7  ;;  %p921_p8 = scmp.lt.s32.totalorder %s915_s7, %s915_s7 }
  0x7b   :  { %667 = vmatpush3.bf16.msra.mxu0 %v754_v5  ;;  %687 = vmatpush3.bf16.msra.mxu1 %v762_v10 }
  0x7c   :  { %668 = vmatprep.subr.bf16.mxu0 %v955_v0  ;;  %688 = vmatprep.subr.bf16.mxu1 %v955_v0  ;;  %p922_p9 = por %p921_p8, %p920_p7 }
  0x7e   :  { %p923_p10 = pnand %p922_p9, %p916_p6 }
  0x7f   :  { %669 = vmatpush3.bf16.msra.mxu0 %v755_v7  ;;  %689 = vmatpush3.bf16.msra.mxu1 %v763_v12 }
  0x80   :  { %670 = vmatprep.subr.bf16.mxu0 %v955_v0  ;;  %690 = vmatprep.subr.bf16.mxu1 %v955_v0 }
  0x83   :  { %671 = vmatpush3.bf16.msra.mxu0 %v756_v9  ;;  %691 = vmatpush3.bf16.msra.mxu1 %v764_v15 }
  0x84   :  { %672 = vmatprep.subr.bf16.mxu0 %v955_v0  ;;  %692 = vmatprep.subr.bf16.mxu1 %v955_v0 }
  0x87   :  { %673 = vmatpush3.bf16.msra.mxu0 %v757_v11  ;;  %693 = vmatpush3.bf16.msra.mxu1 %v765_v17 }
  0x88   :  { %674 = vmatprep.subr.bf16.mxu0 %v955_v0  ;;  %694 = vmatprep.subr.bf16.mxu1 %v955_v0 }
  0x8b   :  { %675 = vmatpush3.bf16.msra.mxu0 %v758_v13  ;;  %695 = vmatpush3.bf16.msra.mxu1 %v766_v18 }
  0x8c   :  { %700 = vmatprep.subr.bf16.mxu0 %v955_v0  ;;  %720 = vmatprep.subr.bf16.mxu1 %v955_v0 }
  0x8e   :  { %677 = vmatmul.mubr.bf16.vlgmr.msra.gmra.mrb[0].mxu0 %v133_v16 }
  0x8f   :  { %716 = vmatprep.mubr.msk.bf16.mxu0 %vm956_vm0, %v955_v0  ;;  %701 = vmatpush3.bf16.msra.mxu0 %v767_v19 }
  0x90   :  { %702 = vmatprep.subr.bf16.mxu0 %v955_v0 }
  0x93   :  { %703 = vmatpush3.bf16.msra.mxu0 %v768_v20 }
  0x94   :  { %704 = vmatprep.subr.bf16.mxu0 %v955_v0 }
  0x97   :  { %705 = vmatpush3.bf16.msra.mxu0 %v769_v21 }
  0x98   :  { %706 = vmatprep.subr.bf16.mxu0 %v955_v0 }
  0x9b   :  { %707 = vmatpush3.bf16.msra.mxu0 %v770_v22 }
  0x9c   :  { %708 = vmatprep.subr.bf16.mxu0 %v955_v0 }
  0x9f   :  { %709 = vmatpush3.bf16.msra.mxu0 %v771_v23 }
  0xa0   :  { %710 = vmatprep.subr.bf16.mxu0 %v955_v0 }
  0xa3   :  { %711 = vmatpush3.bf16.msra.mxu0 %v772_v24 }
  0xa4   :  { %712 = vmatprep.subr.bf16.mxu0 %v955_v0 }
  0xa7   :  { %713 = vmatpush3.bf16.msra.mxu0 %v773_v33 }
  0xa8   :  { %714 = vmatprep.subr.bf16.mxu0 %v955_v0 }
  0xab   :  { %715 = vmatpush3.bf16.msra.mxu0 %v774_v34 }
 0x161   :  { %v222_v26 = vpop.f32.mrb[0].mxu0 }
 0x162   :  { %v223_v27 = vadd.f32 %v588_v25, %v222_v26  ;;  %v678_v28 = vpop.f32.mrb[1].mxu0 }
 0x163   :  { %v225_v29 = vpop.f32.mrb[2].mxu0 }
 0x164   :  { %v228_v30 = vmax.f32 %v223_v27, 0.0  ;;  %v679_v31 = vpop.f32.mrb[3].mxu0 }
 0x166   :  { %v229_v32 = vpack.c.bf16 %v228_v30, %v228_v30 }
 0x168   :  { %697 = vmatmul.mubr.bf16.vlgmr.msra.gmra.mrb[0].mxu1 %v229_v32 }
 0x169   :  { %736 = vmatprep.mubr.msk.bf16.mxu1 %vm956_vm0, %v955_v0  ;;  %721 = vmatpush3.bf16.msra.mxu1 %v775_v35 }
 0x16a   :  { %722 = vmatprep.subr.bf16.mxu1 %v955_v0 }
 0x16d   :  { %723 = vmatpush3.bf16.msra.mxu1 %v776_v36 }
 0x16e   :  { %724 = vmatprep.subr.bf16.mxu1 %v955_v0 }
 0x171   :  { %725 = vmatpush3.bf16.msra.mxu1 %v777_v37 }
 0x172   :  { %726 = vmatprep.subr.bf16.mxu1 %v955_v0 }
 0x175   :  { %727 = vmatpush3.bf16.msra.mxu1 %v778_v38 }
 0x176   :  { %728 = vmatprep.subr.bf16.mxu1 %v955_v0 }
 0x179   :  { %729 = vmatpush3.bf16.msra.mxu1 %v779_v39 }
 0x17a   :  { %730 = vmatprep.subr.bf16.mxu1 %v955_v0 }
 0x17d   :  { %731 = vmatpush3.bf16.msra.mxu1 %v780_v40 }
 0x17e   :  { %732 = vmatprep.subr.bf16.mxu1 %v955_v0 }
 0x181   :  { %733 = vmatpush3.bf16.msra.mxu1 %v781_v49 }
 0x182   :  { %734 = vmatprep.subr.bf16.mxu1 %v955_v0 }
 0x185   :  { %735 = vmatpush3.bf16.msra.mxu1 %v782_v50 }
 0x23b   :  { %v335_v42 = vpop.f32.mrb[0].mxu1 }
 0x23c   :  { %v336_v43 = vadd.f32 %v597_v41, %v335_v42  ;;  %v698_v44 = vpop.f32.mrb[1].mxu1 }
 0x23d   :  { %v338_v45 = vpop.f32.mrb[2].mxu1 }
 0x23e   :  { %v341_v46 = vmax.f32 %v336_v43, 0.0  ;;  %v699_v47 = vpop.f32.mrb[3].mxu1 }
 0x240   :  { %v342_v48 = vpack.c.bf16 %v341_v46, %v341_v46 }
 0x242   :  { %717 = vmatmul.mubr.bf16.vlgmr.msra.gmra.mrb[4].mxu0 %v342_v48 }
 0x315   :  { %v448_v52 = vpop.f32.mrb[4].mxu0 }
 0x316   :  { %v449_v53 = vadd.f32 %v606_v51, %v448_v52  ;;  %v718_v54 = vpop.f32.mrb[5].mxu0 }
 0x317   :  { %v451_v55 = vpop.f32.mrb[6].mxu0 }
 0x318   :  { %v454_v56 = vmax.f32 %v449_v53, 0.0  ;;  %v719_v57 = vpop.f32.mrb[7].mxu0 }
 0x31a   :  { %v455_v58 = vpack.c.bf16 %v454_v56, %v454_v56 }
 0x31c   :  { %737 = vmatmul.mubr.bf16.vlgmr.msra.gmra.mrb[4].mxu1 %v455_v58 }
 0x3ef   :  { %v561_v60 = vpop.f32.mrb[4].mxu1 }
 0x3f0   :  { %v562_v62 = vadd.f32 %v615_v59, %v561_v60  ;;  %v738_v63 = vpop.f32.mrb[5].mxu1 }
 0x3f1   :  { %v564_v0 = vpop.f32.mrb[6].mxu1 }
 0x3f2   :  { %v568_v1 = vadd.f32 %v567_v61, %v562_v62  ;;  %v739_v2 = vpop.f32.mrb[7].mxu1 }
 0x3f4   :  { %569 = vst [vmem:[#allocation13] sm:$0xff] %v568_v1 }
 0x3f5   :  { %926 = shalt.err (!%p923_p10)
}
 0x3f6   :  { %s927_s4 = scalar_lea.hbm %s1171_s10, 128 }
 0x3f7   :  { %p928_p11 = scmp.ne.s32.totalorder %s1171_s10, %s927_s4  ;;  %p931_p12 = scmp.lt.u32.totalorder %s927_s4, %s1171_s10 }
 0x3f9   :  { %p933_p13 = pnand %p931_p12, %p928_p11 }
 0x3fb   :  { %936 = shalt.err (!%p933_p13)
}
 0x3fc   :  { %579 = dma.vmem_to_hbm [thread:$0]  %s577_s27, 128, %s1171_s10, [#allocation4]  }
 0x3fd   :  { %945 = dma.done.wait [#allocation4], 128  }
 0x3fe   :  { %946 = vsyncadd [#allocation4], 4294967168 }
 0x3ff   :  { %583 = vsyncpa [#allocation3], 1 }
 0x400   :  { %584 = vsyncpa [#allocation6], 1 }
 0x401   :  { %585 = vsyncpa [#allocation9], 1 }
 0x402   :  { %586 = vsyncpa [#allocation12], 1 }
 0x403   :  { %587 = vsyncpa [#allocation4], 1 }

// kernel: tpu_custom_call.1
= control target key start
LH: loop header
LB: loop body
LE: loop exit
PB: predicated region body
PF: predicated region fallthrough
CT: control target
= control target key end

     0   :  { %15 = vsyncpa [#allocation3], 0  ;;  %s1161_s0 = inlined_call_operand.hbm [shape: f32[8,128], index: 0, kind: input, shape index: {}]   ;;  %s1162_s1 = inlined_call_operand.hbm [shape: f32[8,128], index: 1, kind: input, shape index: {}]   ;;  %s1163_s2 = inlined_call_operand.hbm [shape: bf16[128,128], index: 2, kind: input, shape index: {}]   ;;  %s1164_s3 = inlined_call_operand.vmem [shape: f32[1,128], index: 3, kind: input, shape index: {}]   ;;  %s1165_s4 = inlined_call_operand.hbm [shape: bf16[128,128], index: 4, kind: input, shape index: {}]   ;;  %s1166_s5 = inlined_call_operand.vmem [shape: f32[1,128], index: 5, kind: input, shape index: {}]   ;;  %s1167_s6 = inlined_call_operand.hbm [shape: bf16[128,128], index: 6, kind: input, shape index: {}]   ;;  %s1168_s7 = inlined_call_operand.vmem [shape: f32[1,128], index: 7, kind: input, shape index: {}]   ;;  %s1169_s8 = inlined_call_operand.hbm [shape: bf16[128,128], index: 8, kind: input, shape index: {}]   ;;  %s1170_s9 = inlined_call_operand.vmem [shape: f32[1,128], index: 9, kind: input, shape index: {}]   ;;  %s1171_s10 = inlined_call_operand.hbm [shape: f32[8,128], index: 10, kind: output, shape index: {}]  }
   0x1   :  { %16 = vsyncpa [#allocation6], 0 }
   0x2   :  { %17 = vsyncpa [#allocation9], 0 }
   0x3   :  { %18 = vsyncpa [#allocation12], 0 }
   0x4   :  { %19 = vsyncpa [#allocation4], 0  ;;  %s947_s13 = smov [#allocation5]   ;;  %s783_s17 = scalar_lea.hbm %s1162_s1, 128 }
   0x5   :  { %s36_s14 = sshll.u32 %s947_s13, 4  ;;  %p784_p0 = scmp.ne.s32.totalorder %s1162_s1, %s783_s17  ;;  %s37_s14 = int_to_ptr.vmem [resolvable:$true] %s36_s14 }
   0x6   :  { %p787_p1 = scmp.lt.u32.totalorder %s783_s17, %s1162_s1 }
   0x8   :  { %p789_p2 = pnand %p787_p1, %p784_p0 }
   0xa   :  { %792 = shalt.err (!%p789_p2)
}
   0xb   :  { %s793_s22 = scalar_lea.vmem %s37_s14, 128  ;;  %p798_p4 = scmp.lt.s32.totalorder %s37_s14, %s37_s14 }
   0xc   :  { %p794_p3 = scmp.ne.s32.totalorder %s37_s14, %s793_s22  ;;  %p799_p5 = scmp.lt.s32.totalorder %s793_s22, %s793_s22 }
   0xe   :  { %p800_p6 = por %p799_p5, %p798_p4 }
  0x10   :  { %p801_p7 = pnand %p800_p6, %p794_p3 }
  0x12   :  { %804 = shalt.err (!%p801_p7)
}
  0x13   :  { %39 = dma.hbm_to_vmem [thread:$0]  %s1162_s1, 128, %s37_s14, [#allocation6]  }
  0x14   :  { %s948_s25 = smov [#allocation8]   ;;  %s949_s27 = smov [#allocation2]  }
  0x15   :  { %s59_s26 = sshll.u32 %s948_s25, 4  ;;  %s26_s28 = sshll.u32 %s949_s27, 4  ;;  %s60_s26 = int_to_ptr.vmem [resolvable:$true] %s59_s26  ;;  %s27_s28 = int_to_ptr.vmem [resolvable:$true] %s26_s28 }
  0x16   :  { %s805_s11 = scalar_lea.hbm %s1165_s4, 1024 }
  0x17   :  { %p806_p8 = scmp.ne.s32.totalorder %s1165_s4, %s805_s11  ;;  %p809_p9 = scmp.lt.u32.totalorder %s805_s11, %s1165_s4 }
  0x19   :  { %p811_p10 = pnand %p809_p9, %p806_p8 }
  0x1b   :  { %814 = shalt.err (!%p811_p10)
}
  0x1c   :  { %s815_s1 = scalar_lea.vmem %s60_s26, 1024  ;;  %p820_p12 = scmp.lt.s32.totalorder %s60_s26, %s60_s26 }
  0x1d   :  { %p816_p11 = scmp.ne.s32.totalorder %s60_s26, %s815_s1  ;;  %p821_p13 = scmp.lt.s32.totalorder %s815_s1, %s815_s1 }
  0x1f   :  { %p822_p0 = por %p821_p13, %p820_p12 }
  0x21   :  { %p823_p1 = pnand %p822_p0, %p816_p11 }
  0x23   :  { %826 = shalt.err (!%p823_p1)
}
  0x24   :  { %s950_s14 = smov 64   ;;  %s951_s17 = smov 4  }
  0x25   :  { %65 = dma.hbm_to_vmem [thread:$0]  %s1165_s4, 1024, %s60_s26, [#allocation9], %s950_s14, %s950_s14, %s951_s17  }
  0x26   :  { %s827_s22 = scalar_lea.hbm %s1161_s0, 128 }
  0x27   :  { %p828_p2 = scmp.ne.s32.totalorder %s1161_s0, %s827_s22  ;;  %p831_p3 = scmp.lt.u32.totalorder %s827_s22, %s1161_s0 }
  0x29   :  { %p833_p4 = pnand %p831_p3, %p828_p2 }
  0x2b   :  { %836 = shalt.err (!%p833_p4)
}
  0x2c   :  { %s837_s29 = scalar_lea.vmem %s27_s28, 128  ;;  %p842_p6 = scmp.lt.s32.totalorder %s27_s28, %s27_s28 }
  0x2d   :  { %p838_p5 = scmp.ne.s32.totalorder %s27_s28, %s837_s29  ;;  %p843_p7 = scmp.lt.s32.totalorder %s837_s29, %s837_s29 }
  0x2f   :  { %p844_p8 = por %p843_p7, %p842_p6 }
  0x31   :  { %p845_p9 = pnand %p844_p8, %p838_p5 }
  0x33   :  { %848 = shalt.err (!%p845_p9)
}
  0x34   :  { %29 = dma.hbm_to_vmem [thread:$0]  %s1161_s0, 128, %s27_s28, [#allocation3]  }
  0x35   :  { %s952_s30 = smov [#allocation7]   ;;  %s953_s12 = smov [#allocation10]  }
  0x36   :  { %s45_s11 = sshll.u32 %s952_s30, 4  ;;  %s73_s13 = sshll.u32 %s953_s12, 4  ;;  %s46_s11 = int_to_ptr.vmem [resolvable:$true] %s45_s11  ;;  %s74_s13 = int_to_ptr.vmem [resolvable:$true] %s73_s13 }
  0x37   :  { %s849_s1 = scalar_lea.hbm %s1163_s2, 1024 }
  0x38   :  { %p850_p10 = scmp.ne.s32.totalorder %s1163_s2, %s849_s1  ;;  %p853_p11 = scmp.lt.u32.totalorder %s849_s1, %s1163_s2 }
  0x3a   :  { %p855_p12 = pnand %p853_p11, %p850_p10 }
  0x3c   :  { %858 = shalt.err (!%p855_p12)
}
  0x3d   :  { %s859_s0 = scalar_lea.vmem %s46_s11, 1024  ;;  %p864_p0 = scmp.lt.s32.totalorder %s46_s11, %s46_s11 }
  0x3e   :  { %p860_p13 = scmp.ne.s32.totalorder %s46_s11, %s859_s0  ;;  %p865_p1 = scmp.lt.s32.totalorder %s859_s0, %s859_s0 }
  0x40   :  { %p866_p2 = por %p865_p1, %p864_p0 }
  0x42   :  { %p867_p3 = pnand %p866_p2, %p860_p13 }
  0x44   :  { %870 = shalt.err (!%p867_p3)
}
  0x45   :  { %51 = dma.hbm_to_vmem [thread:$0]  %s1163_s2, 1024, %s46_s11, [#allocation6], %s950_s14, %s950_s14, %s951_s17  }
  0x46   :  { %s871_s25 = scalar_lea.hbm %s1167_s6, 1024 }
  0x47   :  { %p872_p4 = scmp.ne.s32.totalorder %s1167_s6, %s871_s25  ;;  %p875_p5 = scmp.lt.u32.totalorder %s871_s25, %s1167_s6 }
  0x49   :  { %p877_p6 = pnand %p875_p5, %p872_p4 }
  0x4b   :  { %880 = shalt.err (!%p877_p6)
}
  0x4c   :  { %s881_s30 = scalar_lea.vmem %s74_s13, 1024  ;;  %p886_p8 = scmp.lt.s32.totalorder %s74_s13, %s74_s13 }
  0x4d   :  { %p882_p7 = scmp.ne.s32.totalorder %s74_s13, %s881_s30  ;;  %p887_p9 = scmp.lt.s32.totalorder %s881_s30, %s881_s30 }
  0x4f   :  { %p888_p10 = por %p887_p9, %p886_p8 }
  0x51   :  { %p889_p11 = pnand %p888_p10, %p882_p7 }
  0x53   :  { %892 = shalt.err (!%p889_p11)
}
  0x54   :  { %79 = dma.hbm_to_vmem [thread:$0]  %s1167_s6, 1024, %s74_s13, [#allocation9], %s950_s14, %s950_s14, %s951_s17  }
  0x55   :  { %s954_s12 = smov [#allocation11]   ;;  %s893_s18 = scalar_lea.hbm %s1169_s8, 1024 }
  0x56   :  { %s87_s15 = sshll.u32 %s954_s12, 4  ;;  %p894_p12 = scmp.ne.s32.totalorder %s1169_s8, %s893_s18  ;;  %s88_s15 = int_to_ptr.vmem [resolvable:$true] %s87_s15 }
  0x57   :  { %p897_p13 = scmp.lt.u32.totalorder %s893_s18, %s1169_s8 }
  0x59   :  { %p899_p0 = pnand %p897_p13, %p894_p12 }
  0x5b   :  { %902 = shalt.err (!%p899_p0)
}
  0x5c   :  { %s903_s28 = scalar_lea.vmem %s88_s15, 1024  ;;  %p908_p2 = scmp.lt.s32.totalorder %s88_s15, %s88_s15 }
  0x5d   :  { %p904_p1 = scmp.ne.s32.totalorder %s88_s15, %s903_s28  ;;  %p909_p3 = scmp.lt.s32.totalorder %s903_s28, %s903_s28 }
  0x5f   :  { %p910_p4 = por %p909_p3, %p908_p2 }
  0x61   :  { %p911_p5 = pnand %p910_p4, %p904_p1 }
  0x63   :  { %914 = shalt.err (!%p911_p5)
}
  0x64   :  { %93 = dma.hbm_to_vmem [thread:$0]  %s1169_s8, 1024, %s88_s15, [#allocation12], %s950_s14, %s950_s14, %s951_s17  }
  0x65   :  { %937 = dma.done.wait [#allocation3], 128  }
  0x66   :  { %938 = vsyncadd [#allocation3], 4294967168 }
  0x67   :  { %939 = dma.done.wait [#allocation6], 1152  }
  0x68   :  { %940 = vsyncadd [#allocation6], 4294966144 }
  0x69   :  { %941 = dma.done.wait [#allocation9], 2048  }
  0x6a   :  { %942 = vsyncadd [#allocation9], 4294965248 }
  0x6b   :  { %943 = dma.done.wait [#allocation12], 1024  }
  0x6c   :  { %944 = vsyncadd [#allocation12], 4294966272  ;;  %v955_v0 = vmov 0.0   ;;  %vm956_vm0 = vmmov 0   ;;  %v751_v1 = vld [vmem:[#allocation7] sm:$0xff]   ;;  %v752_v2 = vld [vmem:[#allocation7 + $0x8] sm:$0xff]  }
  0x6d   :  { %660 = vmatprep.subr.bf16.mxu0 %v955_v0  ;;  %676 = vmatprep.mubr.msk.bf16.mxu0 %vm956_vm0, %v955_v0  ;;  %v753_v3 = vld [vmem:[#allocation7 + $0x10] sm:$0xff]   ;;  %v759_v4 = vld [vmem:[#allocation8] sm:$0xff]   ;;  %v754_v5 = vld [vmem:[#allocation7 + $0x18] sm:$0xff]   ;;  %s957_s25 = smov [#allocation13]  }
  0x6e   :  { %680 = vmatprep.subr.bf16.mxu1 %v955_v0  ;;  %696 = vmatprep.mubr.msk.bf16.mxu1 %vm956_vm0, %v955_v0  ;;  %v760_v6 = vld [vmem:[#allocation8 + $0x8] sm:$0xff]   ;;  %v755_v7 = vld [vmem:[#allocation7 + $0x20] sm:$0xff]   ;;  %v761_v8 = vld [vmem:[#allocation8 + $0x10] sm:$0xff]   ;;  %s576_s27 = sshll.u32 %s957_s25, 4  ;;  %s577_s27 = int_to_ptr.vmem [resolvable:$true] %s576_s27 }
  0x6f   :  { %661 = vmatpush3.bf16.msra.mxu0 %v751_v1  ;;  %681 = vmatpush3.bf16.msra.mxu1 %v759_v4  ;;  %v756_v9 = vld [vmem:[#allocation7 + $0x28] sm:$0xff]   ;;  %v762_v10 = vld [vmem:[#allocation8 + $0x18] sm:$0xff]   ;;  %v757_v11 = vld [vmem:[#allocation7 + $0x30] sm:$0xff]   ;;  %p920_p7 = scmp.lt.s32.totalorder %s577_s27, %s577_s27 }
  0x70   :  { %662 = vmatprep.subr.bf16.mxu0 %v955_v0  ;;  %682 = vmatprep.subr.bf16.mxu1 %v955_v0  ;;  %v763_v12 = vld [vmem:[#allocation8 + $0x20] sm:$0xff]   ;;  %v758_v13 = vld [vmem:[#allocation7 + $0x38] sm:$0xff]   ;;  %v115_v14 = vld [vmem:[#allocation2] sm:$0xff] }
  0x71   :  { %v764_v15 = vld [vmem:[#allocation8 + $0x28] sm:$0xff]   ;;  %v133_v16 = vpack.c.bf16 %v115_v14, %v115_v14  ;;  %v765_v17 = vld [vmem:[#allocation8 + $0x30] sm:$0xff]   ;;  %v766_v18 = vld [vmem:[#allocation8 + $0x38] sm:$0xff]  }
  0x72   :  { %v767_v19 = vld [vmem:[#allocation10] sm:$0xff]   ;;  %v768_v20 = vld [vmem:[#allocation10 + $0x8] sm:$0xff]   ;;  %v769_v21 = vld [vmem:[#allocation10 + $0x10] sm:$0xff]  }
  0x73   :  { %663 = vmatpush3.bf16.msra.mxu0 %v752_v2  ;;  %683 = vmatpush3.bf16.msra.mxu1 %v760_v6  ;;  %v770_v22 = vld [vmem:[#allocation10 + $0x18] sm:$0xff]   ;;  %v771_v23 = vld [vmem:[#allocation10 + $0x20] sm:$0xff]   ;;  %v772_v24 = vld [vmem:[#allocation10 + $0x28] sm:$0xff]  }
  0x74   :  { %664 = vmatprep.subr.bf16.mxu0 %v955_v0  ;;  %684 = vmatprep.subr.bf16.mxu1 %v955_v0  ;;  %v588_v25 = vld [vmem:[%s1164_s3] ss:$0 sm:$0xff]  ;;  %v774_v34 = vld [vmem:[#allocation10 + $0x38] sm:$0xff]   ;;  %v775_v35 = vld [vmem:[#allocation11] sm:$0xff]  }
  0x75   :  { %v773_v33 = vld [vmem:[#allocation10 + $0x30] sm:$0xff]   ;;  %v776_v36 = vld [vmem:[#allocation11 + $0x8] sm:$0xff]   ;;  %v778_v38 = vld [vmem:[#allocation11 + $0x18] sm:$0xff]  }
  0x76   :  { %v777_v37 = vld [vmem:[#allocation11 + $0x10] sm:$0xff]   ;;  %v779_v39 = vld [vmem:[#allocation11 + $0x20] sm:$0xff]   ;;  %v780_v40 = vld [vmem:[#allocation11 + $0x28] sm:$0xff]  }
  0x77   :  { %665 = vmatpush3.bf16.msra.mxu0 %v753_v3  ;;  %685 = vmatpush3.bf16.msra.mxu1 %v761_v8  ;;  %v597_v41 = vld [vmem:[%s1166_s5] ss:$0 sm:$0xff]  ;;  %v782_v50 = vld [vmem:[#allocation11 + $0x38] sm:$0xff]  }
  0x78   :  { %666 = vmatprep.subr.bf16.mxu0 %v955_v0  ;;  %686 = vmatprep.subr.bf16.mxu1 %v955_v0  ;;  %v781_v49 = vld [vmem:[#allocation11 + $0x30] sm:$0xff]   ;;  %v567_v61 = vld [vmem:[#allocation5] sm:$0xff] }
  0x79   :  { %v606_v51 = vld [vmem:[%s1168_s7] ss:$0 sm:$0xff]  ;;  %s915_s7 = scalar_lea.vmem %s577_s27, 128 }
  0x7a   :  { %v615_v59 = vld [vmem:[%s1170_s9] ss:$0 sm:$0xff]  ;;  %p916_p6 = scmp.ne.s32.totalorder %s577_s27, %s915_s7  ;;  %p921_p8 = scmp.lt.s32.totalorder %s915_s7, %s915_s7 }
  0x7b   :  { %667 = vmatpush3.bf16.msra.mxu0 %v754_v5  ;;  %687 = vmatpush3.bf16.msra.mxu1 %v762_v10 }
  0x7c   :  { %668 = vmatprep.subr.bf16.mxu0 %v955_v0  ;;  %688 = vmatprep.subr.bf16.mxu1 %v955_v0  ;;  %p922_p9 = por %p921_p8, %p920_p7 }
  0x7e   :  { %p923_p10 = pnand %p922_p9, %p916_p6 }
  0x7f   :  { %669 = vmatpush3.bf16.msra.mxu0 %v755_v7  ;;  %689 = vmatpush3.bf16.msra.mxu1 %v763_v12 }
  0x80   :  { %670 = vmatprep.subr.bf16.mxu0 %v955_v0  ;;  %690 = vmatprep.subr.bf16.mxu1 %v955_v0 }
  0x83   :  { %671 = vmatpush3.bf16.msra.mxu0 %v756_v9  ;;  %691 = vmatpush3.bf16.msra.mxu1 %v764_v15 }
  0x84   :  { %672 = vmatprep.subr.bf16.mxu0 %v955_v0  ;;  %692 = vmatprep.subr.bf16.mxu1 %v955_v0 }
  0x87   :  { %673 = vmatpush3.bf16.msra.mxu0 %v757_v11  ;;  %693 = vmatpush3.bf16.msra.mxu1 %v765_v17 }
  0x88   :  { %674 = vmatprep.subr.bf16.mxu0 %v955_v0  ;;  %694 = vmatprep.subr.bf16.mxu1 %v955_v0 }
  0x8b   :  { %675 = vmatpush3.bf16.msra.mxu0 %v758_v13  ;;  %695 = vmatpush3.bf16.msra.mxu1 %v766_v18 }
  0x8c   :  { %700 = vmatprep.subr.bf16.mxu0 %v955_v0  ;;  %720 = vmatprep.subr.bf16.mxu1 %v955_v0 }
  0x8e   :  { %677 = vmatmul.mubr.bf16.vlgmr.msra.gmra.mrb[0].mxu0 %v133_v16 }
  0x8f   :  { %716 = vmatprep.mubr.msk.bf16.mxu0 %vm956_vm0, %v955_v0  ;;  %701 = vmatpush3.bf16.msra.mxu0 %v767_v19 }
  0x90   :  { %702 = vmatprep.subr.bf16.mxu0 %v955_v0 }
  0x93   :  { %703 = vmatpush3.bf16.msra.mxu0 %v768_v20 }
  0x94   :  { %704 = vmatprep.subr.bf16.mxu0 %v955_v0 }
  0x97   :  { %705 = vmatpush3.bf16.msra.mxu0 %v769_v21 }
  0x98   :  { %706 = vmatprep.subr.bf16.mxu0 %v955_v0 }
  0x9b   :  { %707 = vmatpush3.bf16.msra.mxu0 %v770_v22 }
  0x9c   :  { %708 = vmatprep.subr.bf16.mxu0 %v955_v0 }
  0x9f   :  { %709 = vmatpush3.bf16.msra.mxu0 %v771_v23 }
  0xa0   :  { %710 = vmatprep.subr.bf16.mxu0 %v955_v0 }
  0xa3   :  { %711 = vmatpush3.bf16.msra.mxu0 %v772_v24 }
  0xa4   :  { %712 = vmatprep.subr.bf16.mxu0 %v955_v0 }
  0xa7   :  { %713 = vmatpush3.bf16.msra.mxu0 %v773_v33 }
  0xa8   :  { %714 = vmatprep.subr.bf16.mxu0 %v955_v0 }
  0xab   :  { %715 = vmatpush3.bf16.msra.mxu0 %v774_v34 }
 0x161   :  { %v222_v26 = vpop.f32.mrb[0].mxu0 }
 0x162   :  { %v223_v27 = vadd.f32 %v588_v25, %v222_v26  ;;  %v678_v28 = vpop.f32.mrb[1].mxu0 }
 0x163   :  { %v225_v29 = vpop.f32.mrb[2].mxu0 }
 0x164   :  { %v228_v30 = vmax.f32 %v223_v27, 0.0  ;;  %v679_v31 = vpop.f32.mrb[3].mxu0 }
 0x166   :  { %v229_v32 = vpack.c.bf16 %v228_v30, %v228_v30 }
 0x168   :  { %697 = vmatmul.mubr.bf16.vlgmr.msra.gmra.mrb[0].mxu1 %v229_v32 }
 0x169   :  { %736 = vmatprep.mubr.msk.bf16.mxu1 %vm956_vm0, %v955_v0  ;;  %721 = vmatpush3.bf16.msra.mxu1 %v775_v35 }
 0x16a   :  { %722 = vmatprep.subr.bf16.mxu1 %v955_v0 }
 0x16d   :  { %723 = vmatpush3.bf16.msra.mxu1 %v776_v36 }
 0x16e   :  { %724 = vmatprep.subr.bf16.mxu1 %v955_v0 }
 0x171   :  { %725 = vmatpush3.bf16.msra.mxu1 %v777_v37 }
 0x172   :  { %726 = vmatprep.subr.bf16.mxu1 %v955_v0 }
 0x175   :  { %727 = vmatpush3.bf16.msra.mxu1 %v778_v38 }
 0x176   :  { %728 = vmatprep.subr.bf16.mxu1 %v955_v0 }
 0x179   :  { %729 = vmatpush3.bf16.msra.mxu1 %v779_v39 }
 0x17a   :  { %730 = vmatprep.subr.bf16.mxu1 %v955_v0 }
 0x17d   :  { %731 = vmatpush3.bf16.msra.mxu1 %v780_v40 }
 0x17e   :  { %732 = vmatprep.subr.bf16.mxu1 %v955_v0 }
 0x181   :  { %733 = vmatpush3.bf16.msra.mxu1 %v781_v49 }
 0x182   :  { %734 = vmatprep.subr.bf16.mxu1 %v955_v0 }
 0x185   :  { %735 = vmatpush3.bf16.msra.mxu1 %v782_v50 }
 0x23b   :  { %v335_v42 = vpop.f32.mrb[0].mxu1 }
 0x23c   :  { %v336_v43 = vadd.f32 %v597_v41, %v335_v42  ;;  %v698_v44 = vpop.f32.mrb[1].mxu1 }
 0x23d   :  { %v338_v45 = vpop.f32.mrb[2].mxu1 }
 0x23e   :  { %v341_v46 = vmax.f32 %v336_v43, 0.0  ;;  %v699_v47 = vpop.f32.mrb[3].mxu1 }
 0x240   :  { %v342_v48 = vpack.c.bf16 %v341_v46, %v341_v46 }
 0x242   :  { %717 = vmatmul.mubr.bf16.vlgmr.msra.gmra.mrb[4].mxu0 %v342_v48 }
 0x315   :  { %v448_v52 = vpop.f32.mrb[4].mxu0 }
 0x316   :  { %v449_v53 = vadd.f32 %v606_v51, %v448_v52  ;;  %v718_v54 = vpop.f32.mrb[5].mxu0 }
 0x317   :  { %v451_v55 = vpop.f32.mrb[6].mxu0 }
 0x318   :  { %v454_v56 = vmax.f32 %v449_v53, 0.0  ;;  %v719_v57 = vpop.f32.mrb[7].mxu0 }
 0x31a   :  { %v455_v58 = vpack.c.bf16 %v454_v56, %v454_v56 }
 0x31c   :  { %737 = vmatmul.mubr.bf16.vlgmr.msra.gmra.mrb[4].mxu1 %v455_v58 }
 0x3ef   :  { %v561_v60 = vpop.f32.mrb[4].mxu1 }
 0x3f0   :  { %v562_v62 = vadd.f32 %v615_v59, %v561_v60  ;;  %v738_v63 = vpop.f32.mrb[5].mxu1 }
 0x3f1   :  { %v564_v0 = vpop.f32.mrb[6].mxu1 }
 0x3f2   :  { %v568_v1 = vadd.f32 %v567_v61, %v562_v62  ;;  %v739_v2 = vpop.f32.mrb[7].mxu1 }
 0x3f4   :  { %569 = vst [vmem:[#allocation13] sm:$0xff] %v568_v1 }
 0x3f5   :  { %926 = shalt.err (!%p923_p10)
}
 0x3f6   :  { %s927_s4 = scalar_lea.hbm %s1171_s10, 128 }
 0x3f7   :  { %p928_p11 = scmp.ne.s32.totalorder %s1171_s10, %s927_s4  ;;  %p931_p12 = scmp.lt.u32.totalorder %s927_s4, %s1171_s10 }
 0x3f9   :  { %p933_p13 = pnand %p931_p12, %p928_p11 }
 0x3fb   :  { %936 = shalt.err (!%p933_p13)
}
 0x3fc   :  { %579 = dma.vmem_to_hbm [thread:$0]  %s577_s27, 128, %s1171_s10, [#allocation4]  }
 0x3fd   :  { %945 = dma.done.wait [#allocation4], 128  }
 0x3fe   :  { %946 = vsyncadd [#allocation4], 4294967168 }
 0x3ff   :  { %583 = vsyncpa [#allocation3], 1 }
 0x400   :  { %584 = vsyncpa [#allocation6], 1 }
 0x401   :  { %585 = vsyncpa [#allocation9], 1 }
 0x402   :  { %586 = vsyncpa [#allocation12], 1 }
 0x403   :  { %587 = vsyncpa [#allocation4], 1 }

</bundles_post_ra>
